<compile_context>
chip_gen: v5e
topology: v5e:2x2
jax: 0.10.0
libtpu: 0.0.40
codegen_flags: <defaults>
</compile_context>

<pallas_src>
import functools

import jax
import jax.numpy as jnp
import numpy as np
from jax.experimental import pallas as pl
from jax.experimental.pallas import tpu as pltpu


def _identity_block_kernel(x_ref, m_ref, w1_ref, w2_ref, w3_ref,
                           b1_ref, b2_ref, b3_ref, o_ref, *, W):
    """One batch-slab per grid step. Channels on sublanes, Bn*H*W pixels on lanes.

    x_ref : (C, L)  f32, L = Bn*H*W        m_ref : (8, L) f32 {0,1} border masks
    w1_ref: (F1, C)    bf16 (BN1 folded)   b1_ref: (F1, 1) f32
    w2_ref: (F2, 9*F1) bf16 (BN2 folded)   b2_ref: (F2, 1) f32
    w3_ref: (C,  F2)   bf16 (BN3 folded)   b3_ref: (C,  1) f32
    o_ref : (C, L)  f32
    """
    L = x_ref.shape[-1]

    x = x_ref[...]                                           # (C, L) f32, kept for residual
    masks = m_ref[...]                                       # (8, L) f32 {0,1}

    # --- conv1: 1x1 (BN folded) + bias + ReLU; native bf16 MXU, f32 acc -----
    y1 = jnp.dot(w1_ref[...], x.astype(jnp.bfloat16),
                 preferred_element_type=jnp.float32)
    y1 = jnp.maximum(y1 + b1_ref[...], 0.0)                  # (F1, L) f32

    # --- conv2: 3x3, pad=1 -> im2col via 9 static lane rolls + precomputed
    #     border masks, then ONE fat K=9*F1 matmul.  Rolls that wrap across
    #     image boundaries inside the slab only land on positions the border
    #     masks already zero, so batching on lanes stays correct. ------------
    taps = []
    mi = 0
    for dy in (-1, 0, 1):
        for dx in (-1, 0, 1):
            s = dy * W + dx                                  # flat pixel shift
            t = y1 if s == 0 else pltpu.roll(y1, (-s) % L, axis=1)
            if not (dy == 0 and dx == 0):
                t = t * masks[mi:mi + 1, :]
                mi += 1
            taps.append(t)
    patches = jnp.concatenate(taps, axis=0)                  # (9*F1, L) f32, tile-aligned concat

    y2 = jnp.dot(w2_ref[...], patches.astype(jnp.bfloat16),
                 preferred_element_type=jnp.float32)         # single K=9*F1 dot
    y2 = jnp.maximum(y2 + b2_ref[...], 0.0)                  # (F2, L) f32

    # --- conv3: 1x1 + bias, residual add, final ReLU ------------------------
    y3 = jnp.dot(w3_ref[...], y2.astype(jnp.bfloat16),
                 preferred_element_type=jnp.float32)
    y3 = y3 + b3_ref[...]                                    # (C, L) f32
    o_ref[...] = jnp.maximum(y3 + x, 0.0).astype(o_ref.dtype)


def identity_block(x_nchw, params):
    """Pallas forward. x_nchw: (N, C, H, W) float32. Params as in __main__."""
    w1, w2, w3, s1, b1, s2, b2, s3, b3 = params
    N, C, H, W = x_nchw.shape
    F1 = w1.shape[1]
    F2 = w2.shape[3]
    F3 = w3.shape[1]
    assert F3 == C, "identity block requires F3 == in_channel"
    HW = H * W

    # Grid choice: 2 "parallel" steps when possible (both v7x TensorCores get
    # work; harmless on single-TC v5e/v6e), rest of the batch folded onto the
    # lane axis.  Fall back to one fat step if the lane block would not be
    # 128-aligned.
    steps = 2 if (N >= 2 and N % 2 == 0) else 1
    Bn = N // steps
    if steps > 1 and (Bn * HW) % 128 != 0:
        steps, Bn = 1, N
    L = Bn * HW

    # Fold BN scales into the conv weights (host-side, tiny, one-time),
    # transpose to (C_out, C_in*k), cast to bf16 for the native MXU path.
    w1f = (w1 * s1).T.astype(jnp.bfloat16)                                        # (F1, C)
    w2f = (w2 * s2.reshape(1, 1, 1, F2)).reshape(9 * F1, F2).T.astype(jnp.bfloat16)  # (F2, 9*F1)
    w3f = (w3 * s3).T.astype(jnp.bfloat16)                                        # (F3, F2)
    b1c = b1.reshape(F1, 1)
    b2c = b2.reshape(F2, 1)
    b3c = b3.reshape(F3, 1)

    # Precomputed 3x3 border masks (depend only on H, W, Bn): (8, L) of {0,1}.
    rr = np.arange(HW) // W
    cc = np.arange(HW) % W
    mask_rows = []
    for dy in (-1, 0, 1):
        for dx in (-1, 0, 1):
            if dy == 0 and dx == 0:
                continue
            m = np.ones(HW, dtype=bool)
            if dy == -1:
                m &= rr >= 1
            elif dy == 1:
                m &= rr < H - 1
            if dx == -1:
                m &= cc >= 1
            elif dx == 1:
                m &= cc < W - 1
            mask_rows.append(m)
    masks = jnp.asarray(np.tile(np.stack(mask_rows).astype(np.float32), (1, Bn)))  # (8, L)

    # Channel-major, batch-on-lanes slab (C, N*HW): pure layout plumbing.
    x_cl = jnp.transpose(x_nchw.reshape(N, C, HW), (1, 0, 2)).reshape(C, N * HW)

    kernel = functools.partial(_identity_block_kernel, W=W)
    out = pl.pallas_call(
        kernel,
        out_shape=jax.ShapeDtypeStruct((C, N * HW), x_nchw.dtype),
        grid=(steps,),
        in_specs=[
            pl.BlockSpec((C, L), lambda n: (0, n)),          # x slab
            pl.BlockSpec((8, L), lambda n: (0, 0)),          # border masks
            pl.BlockSpec((F1, C), lambda n: (0, 0)),         # w1 (BN1 folded)
            pl.BlockSpec((F2, 9 * F1), lambda n: (0, 0)),    # w2 (BN2 folded)
            pl.BlockSpec((F3, F2), lambda n: (0, 0)),        # w3 (BN3 folded)
            pl.BlockSpec((F1, 1), lambda n: (0, 0)),         # bn1 bias
            pl.BlockSpec((F2, 1), lambda n: (0, 0)),         # bn2 bias
            pl.BlockSpec((F3, 1), lambda n: (0, 0)),         # bn3 bias
        ],
        out_specs=pl.BlockSpec((C, L), lambda n: (0, n)),
        compiler_params=pltpu.CompilerParams(
            dimension_semantics=("parallel",),
            vmem_limit_bytes=32 * 1024 * 1024),              # explicit headroom (v7x: 64 MiB phys)
    )(x_cl, masks, w1f, w2f, w3f, b1c, b2c, b3c)

    return jnp.transpose(out.reshape(C, N, HW), (1, 0, 2)).reshape(N, C, H, W)


def identity_block_ref(x_nchw, params):
    """Pure-JAX reference (XLA convs, f32/HIGHEST precision) for validation."""
    w1, w2, w3, s1, b1, s2, b2, s3, b3 = params
    hi = jax.lax.Precision.HIGHEST
    x = jnp.transpose(x_nchw, (0, 2, 3, 1))
    dn = ('NHWC', 'HWIO', 'NHWC')
    y = jax.lax.conv_general_dilated(x, w1[None, None], (1, 1), 'VALID',
                                     dimension_numbers=dn, precision=hi)
    y = jnp.maximum(y * s1 + b1, 0.0)
    y = jax.lax.conv_general_dilated(y, w2, (1, 1), ((1, 1), (1, 1)),
                                     dimension_numbers=dn, precision=hi)
    y = jnp.maximum(y * s2 + b2, 0.0)
    y = jax.lax.conv_general_dilated(y, w3[None, None], (1, 1), 'VALID',
                                     dimension_numbers=dn, precision=hi)
    y = y * s3 + b3
    y = jnp.maximum(y + x, 0.0)
    return jnp.transpose(y, (0, 3, 1, 2))


if __name__ == "__main__":
    # Module config: IndentityBlock(in_channel=4, f=3, filters=(8, 8, 4),
    #                               p1=0, p2=1, p3=0)  -> output shape == input shape
    N, C, H, W = 2, 4, 16, 16
    F1, F2, F3 = 8, 8, 4
    f = 3
    eps = 1e-5

    key = jax.random.PRNGKey(0)
    keys = jax.random.split(key, 5)
    x = jax.random.normal(keys[0], (N, C, H, W), jnp.float32)

    # Conv weights (bias=False in the module), deterministic init.
    w1 = 0.2 * jax.random.normal(keys[1], (C, F1), jnp.float32)          # 1x1: (Cin, Cout)
    w2 = 0.1 * jax.random.normal(keys[2], (f, f, F1, F2), jnp.float32)   # 3x3: HWIO
    w3 = 0.2 * jax.random.normal(keys[3], (F2, F3), jnp.float32)         # 1x1: (Cin, Cout)

    # BatchNorm (inference form) folded into per-channel scale/bias.
    # TODO(synk): training-mode BN (batch statistics + running-stat update) is not implemented.
    def bn_fold(k, F):
        kg, kb, km, kv = jax.random.split(k, 4)
        gamma = 1.0 + 0.1 * jax.random.normal(kg, (1, F), jnp.float32)
        beta = 0.1 * jax.random.normal(kb, (1, F), jnp.float32)
        mean = 0.1 * jax.random.normal(km, (1, F), jnp.float32)
        var = jnp.abs(jax.random.normal(kv, (1, F), jnp.float32)) + 0.5
        s = gamma / jnp.sqrt(var + eps)
        b = beta - mean * s
        return s, b

    kbn = jax.random.split(keys[4], 3)
    s1, b1 = bn_fold(kbn[0], F1)
    s2, b2 = bn_fold(kbn[1], F2)
    s3, b3 = bn_fold(kbn[2], F3)
    params = (w1, w2, w3, s1, b1, s2, b2, s3, b3)

    out = identity_block(x, params)
    out = jax.block_until_ready(out)

    ref = identity_block_ref(x, params)
    # bf16 MXU path vs f32/HIGHEST reference -> loosened tolerance.
    np.testing.assert_allclose(np.asarray(out), np.asarray(ref),
                               rtol=2e-2, atol=2e-2)
    print("KERNEL_OK")
</pallas_src>

<mosaic_0001>
module attributes {stable_mosaic.version = 11 : i64} {
  func.func @_identity_block_kernel(%arg0: i32, %arg1: memref<4x256xf32, #tpu.memory_space<vmem>>, %arg2: memref<8x256xf32, #tpu.memory_space<vmem>>, %arg3: memref<8x4xbf16, #tpu.memory_space<vmem>>, %arg4: memref<8x72xbf16, #tpu.memory_space<vmem>>, %arg5: memref<4x8xbf16, #tpu.memory_space<vmem>>, %arg6: memref<8x1xf32, #tpu.memory_space<vmem>>, %arg7: memref<8x1xf32, #tpu.memory_space<vmem>>, %arg8: memref<4x1xf32, #tpu.memory_space<vmem>>, %arg9: memref<4x256xf32, #tpu.memory_space<vmem>>) attributes {dimension_semantics = [#tpu.dimension_semantics<parallel>], iteration_bounds = array<i64: 2>, scalar_prefetch = 0 : i64, scratch_operands = 0 : i64, tpu.core_type = #tpu.core_type<tc>, window_params = [{transform_indices = @transform_0, window_bounds = array<i64: 4, 256>}, {pipeline_mode = #tpu.pipeline_mode<synchronous>, transform_indices = @transform_1, window_bounds = array<i64: 8, 256>}, {pipeline_mode = #tpu.pipeline_mode<synchronous>, transform_indices = @transform_2, window_bounds = array<i64: 8, 4>}, {pipeline_mode = #tpu.pipeline_mode<synchronous>, transform_indices = @transform_3, window_bounds = array<i64: 8, 72>}, {pipeline_mode = #tpu.pipeline_mode<synchronous>, transform_indices = @transform_4, window_bounds = array<i64: 4, 8>}, {pipeline_mode = #tpu.pipeline_mode<synchronous>, transform_indices = @transform_5, window_bounds = array<i64: 8, 1>}, {pipeline_mode = #tpu.pipeline_mode<synchronous>, transform_indices = @transform_6, window_bounds = array<i64: 8, 1>}, {pipeline_mode = #tpu.pipeline_mode<synchronous>, transform_indices = @transform_7, window_bounds = array<i64: 4, 1>}, {transform_indices = @transform_8, window_bounds = array<i64: 4, 256>}]} {
    %c0 = arith.constant 0 : index
    %c0_0 = arith.constant 0 : index
    %0 = vector.load %arg1[%c0, %c0_0] : memref<4x256xf32, #tpu.memory_space<vmem>>, vector<4x256xf32>
    %c0_1 = arith.constant 0 : index
    %c0_2 = arith.constant 0 : index
    %1 = vector.load %arg2[%c0_1, %c0_2] : memref<8x256xf32, #tpu.memory_space<vmem>>, vector<8x256xf32>
    %c0_3 = arith.constant 0 : index
    %c0_4 = arith.constant 0 : index
    %2 = vector.load %arg3[%c0_3, %c0_4] : memref<8x4xbf16, #tpu.memory_space<vmem>>, vector<8x4xbf16>
    %3 = arith.truncf %0 : vector<4x256xf32> to vector<4x256xbf16>
    %cst = arith.constant dense<0.000000e+00> : vector<8x256xf32>
    %4 = tpu.matmul %2, %3, %cst {dimension_numbers = #tpu.dot_dimension_numbers<[1], [0], [0], [1], [0, 0, 1, 1], [], []>} : vector<8x4xbf16>, vector<4x256xbf16>, vector<8x256xf32> -> vector<8x256xf32>
    %c0_5 = arith.constant 0 : index
    %c0_6 = arith.constant 0 : index
    %5 = vector.load %arg6[%c0_5, %c0_6] : memref<8x1xf32, #tpu.memory_space<vmem>>, vector<8x1xf32>
    %6 = vector.broadcast %5 : vector<8x1xf32> to vector<8x256xf32>
    %7 = arith.addf %4, %6 : vector<8x256xf32>
    %cst_7 = arith.constant 0.000000e+00 : f32
    %8 = vector.broadcast %cst_7 : f32 to vector<8x256xf32>
    %9 = arith.maximumf %7, %8 : vector<8x256xf32>
    %c17_i32 = arith.constant 17 : i32
    %10 = tpu.dynamic_rotate %9 by %c17_i32 dim 1 : vector<8x256xf32>, i32 -> vector<8x256xf32>
    %11 = vector.extract_strided_slice %1 {offsets = [0, 0], sizes = [1, 256], strides = [1, 1]} : vector<8x256xf32> to vector<1x256xf32>
    %12 = vector.broadcast %11 : vector<1x256xf32> to vector<8x256xf32>
    %13 = arith.mulf %10, %12 : vector<8x256xf32>
    %c16_i32 = arith.constant 16 : i32
    %14 = tpu.dynamic_rotate %9 by %c16_i32 dim 1 : vector<8x256xf32>, i32 -> vector<8x256xf32>
    %15 = vector.extract_strided_slice %1 {offsets = [1, 0], sizes = [1, 256], strides = [1, 1]} : vector<8x256xf32> to vector<1x256xf32>
    %16 = vector.broadcast %15 : vector<1x256xf32> to vector<8x256xf32>
    %17 = arith.mulf %14, %16 : vector<8x256xf32>
    %c15_i32 = arith.constant 15 : i32
    %18 = tpu.dynamic_rotate %9 by %c15_i32 dim 1 : vector<8x256xf32>, i32 -> vector<8x256xf32>
    %19 = vector.extract_strided_slice %1 {offsets = [2, 0], sizes = [1, 256], strides = [1, 1]} : vector<8x256xf32> to vector<1x256xf32>
    %20 = vector.broadcast %19 : vector<1x256xf32> to vector<8x256xf32>
    %21 = arith.mulf %18, %20 : vector<8x256xf32>
    %c1_i32 = arith.constant 1 : i32
    %22 = tpu.dynamic_rotate %9 by %c1_i32 dim 1 : vector<8x256xf32>, i32 -> vector<8x256xf32>
    %23 = vector.extract_strided_slice %1 {offsets = [3, 0], sizes = [1, 256], strides = [1, 1]} : vector<8x256xf32> to vector<1x256xf32>
    %24 = vector.broadcast %23 : vector<1x256xf32> to vector<8x256xf32>
    %25 = arith.mulf %22, %24 : vector<8x256xf32>
    %c255_i32 = arith.constant 255 : i32
    %26 = tpu.dynamic_rotate %9 by %c255_i32 dim 1 : vector<8x256xf32>, i32 -> vector<8x256xf32>
    %27 = vector.extract_strided_slice %1 {offsets = [4, 0], sizes = [1, 256], strides = [1, 1]} : vector<8x256xf32> to vector<1x256xf32>
    %28 = vector.broadcast %27 : vector<1x256xf32> to vector<8x256xf32>
    %29 = arith.mulf %26, %28 : vector<8x256xf32>
    %c241_i32 = arith.constant 241 : i32
    %30 = tpu.dynamic_rotate %9 by %c241_i32 dim 1 : vector<8x256xf32>, i32 -> vector<8x256xf32>
    %31 = vector.extract_strided_slice %1 {offsets = [5, 0], sizes = [1, 256], strides = [1, 1]} : vector<8x256xf32> to vector<1x256xf32>
    %32 = vector.broadcast %31 : vector<1x256xf32> to vector<8x256xf32>
    %33 = arith.mulf %30, %32 : vector<8x256xf32>
    %c240_i32 = arith.constant 240 : i32
    %34 = tpu.dynamic_rotate %9 by %c240_i32 dim 1 : vector<8x256xf32>, i32 -> vector<8x256xf32>
    %35 = vector.extract_strided_slice %1 {offsets = [6, 0], sizes = [1, 256], strides = [1, 1]} : vector<8x256xf32> to vector<1x256xf32>
    %36 = vector.broadcast %35 : vector<1x256xf32> to vector<8x256xf32>
    %37 = arith.mulf %34, %36 : vector<8x256xf32>
    %c239_i32 = arith.constant 239 : i32
    %38 = tpu.dynamic_rotate %9 by %c239_i32 dim 1 : vector<8x256xf32>, i32 -> vector<8x256xf32>
    %39 = vector.extract_strided_slice %1 {offsets = [7, 0], sizes = [1, 256], strides = [1, 1]} : vector<8x256xf32> to vector<1x256xf32>
    %40 = vector.broadcast %39 : vector<1x256xf32> to vector<8x256xf32>
    %41 = arith.mulf %38, %40 : vector<8x256xf32>
    %42 = tpu.concatenate %13, %17, %21, %25, %9, %29, %33, %37, %41 in 0 : vector<8x256xf32>, vector<8x256xf32>, vector<8x256xf32>, vector<8x256xf32>, vector<8x256xf32>, vector<8x256xf32>, vector<8x256xf32>, vector<8x256xf32>, vector<8x256xf32> -> vector<72x256xf32>
    %c0_8 = arith.constant 0 : index
    %c0_9 = arith.constant 0 : index
    %43 = vector.load %arg4[%c0_8, %c0_9] : memref<8x72xbf16, #tpu.memory_space<vmem>>, vector<8x72xbf16>
    %44 = arith.truncf %42 : vector<72x256xf32> to vector<72x256xbf16>
    %cst_10 = arith.constant dense<0.000000e+00> : vector<8x256xf32>
    %45 = tpu.matmul %43, %44, %cst_10 {dimension_numbers = #tpu.dot_dimension_numbers<[1], [0], [0], [1], [0, 0, 1, 1], [], []>} : vector<8x72xbf16>, vector<72x256xbf16>, vector<8x256xf32> -> vector<8x256xf32>
    %c0_11 = arith.constant 0 : index
    %c0_12 = arith.constant 0 : index
    %46 = vector.load %arg7[%c0_11, %c0_12] : memref<8x1xf32, #tpu.memory_space<vmem>>, vector<8x1xf32>
    %47 = vector.broadcast %46 : vector<8x1xf32> to vector<8x256xf32>
    %48 = arith.addf %45, %47 : vector<8x256xf32>
    %cst_13 = arith.constant 0.000000e+00 : f32
    %49 = vector.broadcast %cst_13 : f32 to vector<8x256xf32>
    %50 = arith.maximumf %48, %49 : vector<8x256xf32>
    %c0_14 = arith.constant 0 : index
    %c0_15 = arith.constant 0 : index
    %51 = vector.load %arg5[%c0_14, %c0_15] : memref<4x8xbf16, #tpu.memory_space<vmem>>, vector<4x8xbf16>
    %52 = arith.truncf %50 : vector<8x256xf32> to vector<8x256xbf16>
    %cst_16 = arith.constant dense<0.000000e+00> : vector<4x256xf32>
    %53 = tpu.matmul %51, %52, %cst_16 {dimension_numbers = #tpu.dot_dimension_numbers<[1], [0], [0], [1], [0, 0, 1, 1], [], []>} : vector<4x8xbf16>, vector<8x256xbf16>, vector<4x256xf32> -> vector<4x256xf32>
    %c0_17 = arith.constant 0 : index
    %c0_18 = arith.constant 0 : index
    %54 = vector.load %arg8[%c0_17, %c0_18] : memref<4x1xf32, #tpu.memory_space<vmem>>, vector<4x1xf32>
    %55 = vector.broadcast %54 : vector<4x1xf32> to vector<4x256xf32>
    %56 = arith.addf %53, %55 : vector<4x256xf32>
    %57 = arith.addf %56, %0 : vector<4x256xf32>
    %cst_19 = arith.constant 0.000000e+00 : f32
    %58 = vector.broadcast %cst_19 : f32 to vector<4x256xf32>
    %59 = arith.maximumf %57, %58 : vector<4x256xf32>
    %c0_20 = arith.constant 0 : index
    %c0_21 = arith.constant 0 : index
    %60 = vector.load %arg9[%c0_20, %c0_21] : memref<4x256xf32, #tpu.memory_space<vmem>>, vector<4x256xf32>
    tpu.vector_store %arg9[%c0_20, %c0_21], %59 {strides = array<i32>} : memref<4x256xf32, #tpu.memory_space<vmem>>, vector<4x256xf32>,
    return
  }
  func.func @transform_0(%arg0: i32) -> (i32, i32) {
    %c0_i32 = arith.constant 0 : i32
    %c0_i32_0 = arith.constant 0 : i32
    return %c0_i32, %arg0 : i32, i32
  }
  func.func @transform_1(%arg0: i32) -> (i32, i32) {
    %c0_i32 = arith.constant 0 : i32
    %c0_i32_0 = arith.constant 0 : i32
    %c0_i32_1 = arith.constant 0 : i32
    return %c0_i32, %c0_i32_0 : i32, i32
  }
  func.func @transform_2(%arg0: i32) -> (i32, i32) {
    %c0_i32 = arith.constant 0 : i32
    %c0_i32_0 = arith.constant 0 : i32
    %c0_i32_1 = arith.constant 0 : i32
    return %c0_i32, %c0_i32_0 : i32, i32
  }
  func.func @transform_3(%arg0: i32) -> (i32, i32) {
    %c0_i32 = arith.constant 0 : i32
    %c0_i32_0 = arith.constant 0 : i32
    %c0_i32_1 = arith.constant 0 : i32
    return %c0_i32, %c0_i32_0 : i32, i32
  }
  func.func @transform_4(%arg0: i32) -> (i32, i32) {
    %c0_i32 = arith.constant 0 : i32
    %c0_i32_0 = arith.constant 0 : i32
    %c0_i32_1 = arith.constant 0 : i32
    return %c0_i32, %c0_i32_0 : i32, i32
  }
  func.func @transform_5(%arg0: i32) -> (i32, i32) {
    %c0_i32 = arith.constant 0 : i32
    %c0_i32_0 = arith.constant 0 : i32
    %c0_i32_1 = arith.constant 0 : i32
    return %c0_i32, %c0_i32_0 : i32, i32
  }
  func.func @transform_6(%arg0: i32) -> (i32, i32) {
    %c0_i32 = arith.constant 0 : i32
    %c0_i32_0 = arith.constant 0 : i32
    %c0_i32_1 = arith.constant 0 : i32
    return %c0_i32, %c0_i32_0 : i32, i32
  }
  func.func @transform_7(%arg0: i32) -> (i32, i32) {
    %c0_i32 = arith.constant 0 : i32
    %c0_i32_0 = arith.constant 0 : i32
    %c0_i32_1 = arith.constant 0 : i32
    return %c0_i32, %c0_i32_0 : i32, i32
  }
  func.func @transform_8(%arg0: i32) -> (i32, i32) {
    %c0_i32 = arith.constant 0 : i32
    %c0_i32_0 = arith.constant 0 : i32
    return %c0_i32, %arg0 : i32, i32
  }
}

</mosaic_0001>

<bundles_post_ra>
// kernel: tpu_custom_call.1
= control target key start
LH: loop header
LB: loop body
LE: loop exit
PB: predicated region body
PF: predicated region fallthrough
CT: control target
= control target key end

     0   :  { %13 = vsyncpa [#allocation3], 0  ;;  %s1072_s0 = inlined_call_operand.vmem [shape: f32[4,512], index: 0, kind: input, shape index: {}]   ;;  %s1073_s1 = inlined_call_operand.hbm [shape: f32[8,256], index: 1, kind: input, shape index: {}]   ;;  %s1074_s2 = inlined_call_operand.vmem [shape: bf16[8,4], index: 2, kind: input, shape index: {}]   ;;  %s1075_s3 = inlined_call_operand.vmem [shape: bf16[8,72], index: 3, kind: input, shape index: {}]   ;;  %s1076_s4 = inlined_call_operand.vmem [shape: bf16[4,8], index: 4, kind: input, shape index: {}]   ;;  %s1077_s5 = inlined_call_operand.vmem [shape: f32[8,1], index: 5, kind: input, shape index: {}]   ;;  %s1078_s6 = inlined_call_operand.vmem [shape: f32[8,1], index: 6, kind: input, shape index: {}]   ;;  %s1079_s7 = inlined_call_operand.vmem [shape: f32[4,1], index: 7, kind: input, shape index: {}]   ;;  %s1080_s8 = inlined_call_operand.hbm [shape: f32[4,512], index: 8, kind: output, shape index: {}]  }
   0x1   :  { %14 = vsyncpa [#allocation4], 0 }
   0x2   :  { %16 = vsyncpa [#allocation4 + $0x1], 0  ;;  %s909_s27 = smov 0   ;;  %s911_s28 = smov 0  }
   0x3   :  { %s913_s29 = smov 0   ;;  %s915_s30 = smov 0  }
   0x4 LB: > { %s930_s9 = sadd.s32 4294967295, %s852_s30   ;;  %s674_s10 = sadd.s32 4294967294, %s852_s30   ;;  %s852_s30 = sphi %s915_s30, %s1086_s30   ;;  %s848_s29 = sphi %s913_s29, %s1085_s29   ;;  %s844_s28 = sphi %s911_s28, %s1084_s28   ;;  %s840_s27 = sphi %s909_s27, %s1083_s27  }
   0x5   : > { %s934_s11 = sadd.s32 1, %s852_s30   ;;  %s202_s12 = sadd.s32 1, %s848_s29 }
   0x6   : > { %s199_s13 = ssub.s32 %s852_s30, %s934_s11  ;;  %p212_p0 = scmp.ne.s32.totalorder %s848_s29, %s844_s28 }
   0x7   : > { %p200_p1 = scmp.eq.s32.totalorder %s199_s13, 0  ;;  %p213_p2 = scmp.eq.s32.totalorder %s930_s9, 1 }
   0x8   : > { %p218_p3 = scmp.ne.s32.totalorder %s844_s28, %s840_s27  ;;  %p219_p4 = scmp.eq.s32.totalorder %s674_s10, 1 }
   0x9   : > { %s945_s14 = scalar_select %p200_p1, %s848_s29, %s202_s12  }
   0xa   : > { %p947_p5 = por %p213_p2, %p212_p0  ;;  %p951_p6 = por %p219_p4, %p218_p3 }
   0xb   : > { %p675_p7 = scmp.ge.s32.totalorder %s852_s30, 1  ;;  %p226_p8 = scmp.lt.s32.totalorder %s852_s30, 3 }
   0xc   : > { %p709_p9 = scmp.eq.s32.totalorder %s930_s9, 0  ;;  %s238_s19 = sshll.u32 %s1073_s1, 4  ;;  %s239_s19 = int_to_ptr.hbm [resolvable:$true] %s238_s19 }
   0xd   : > { %p227_p10 = pnand %p675_p7, %p226_p8  ;;  %s854_s20 = smov [#allocation2]  }
   0xe   : > { %s240_s21 = sshll.u32 %s854_s20, 4  ;;  %s241_s21 = int_to_ptr.vmem [resolvable:$true] %s240_s21 }
   0xf   : > { %p701_p11 = pneg %p227_p10  ;;  %280 = sbr.rel (%p227_p10) target bundleno = 615 (0x267), region = 52 }
  0x11   : > { %p702_p12 = pnand %p709_p9, %p701_p11 }
  0x13   : > { %704 = dma.hbm_to_vmem [thread:$0]  (!%p702_p12), %s239_s19, 256, %s241_s21, [#allocation3]  }
  0x14   : > { %831 = dma.done.wait (%p709_p9), [#allocation3], 256  }
  0x15   : > { %833 = vsyncadd (%p709_p9), [#allocation3], 4294967040  ;;  %s681_s22 = sshll.u32 %s930_s9, 1  ;;  %v855_v0 = vmov 0   ;;  %v335_v2 = vld [vmem:[%s1077_s5] sm:$0xff]  ;;  %vm345_vm0 = vcmask 1041408   ;;  %v384_v20 = vlaneseq }
  0x16   : > { %p316_p13 = scmp.lt.s32.totalorder %s681_s22, 3  ;;  %754 = vset.pattern.permute.xlu0 %v855_v0  ;;  %755 = vset.pattern.permute.xlu2 %v855_v0  ;;  %v326_v9 = vld [vmem:[%s1074_s2] sm:$0xf]  ;;  %vm341_vm1 = vcmask 31744   ;;  %s856_s18 = smov 113   ;;  %v996_v23 = vld [vmem:[#allocation2] sm:$0xff] }
  0x17   : > { %338 = vperm.xlu0 %754, %v335_v2   ;;  %s857_s19 = smov 111   ;;  %s858_s20 = smov 112   ;;  %v529_v19 = vld [vmem:[%s1079_s7] sm:$0xf]  ;;  %v994_v22 = vand.u32 127, %v384_v20  ;;  %v998_v24 = vld [vmem:[#allocation2 + $0x8] sm:$0xff] }
  0x18   : > { %s1088_s22 = smov (!%p316_p13, %s681_s22), 3  ;;  %s859_s21 = smov 127   ;;  %v466_v25 = vperm.slane %v996_v23, 7  ;;  %v467_v26 = vperm.slane %v998_v24, 7  ;;  %vm491_vm3 = vcmask 1043456   ;;  %v444_v36 = vperm.slane %v996_v23, 5 }
  0x19   : > { %s682_s23 = sshll.u32 %s1088_s22, 2  ;;  %s860_s22 = smov 15   ;;  %vm463_vm2 = vcmp.lt.s32.totalorder %v994_v22, 111  ;;  %vm441_vm4 = vcmp.lt.s32.totalorder %v994_v22, 113  ;;  %v445_v37 = vperm.slane %v998_v24, 5  ;;  %vm452_vm5 = vcmp.lt.s32.totalorder %v994_v22, 112 }
  0x1a   : > { %s319_s26 = scalar_lea.vmem %s1072_s0, %s682_s23  ;;  %s861_s23 = smov 1   ;;  %v455_v40 = vperm.slane %v996_v23, 6  ;;  %v456_v41 = vperm.slane %v998_v24, 6  ;;  %vm430_vm6 = vcmp.lt.s32.totalorder %v994_v22, 127  ;;  %v433_v54 = vperm.slane %v996_v23, 4  ;;  %v481_v61 = vld [vmem:[%s1078_s6] sm:$0xff] }
  0x1b   : > { %v323_v1 = vld [vmem:[%s319_s26] sm:$0xff]  ;;  %s862_s24 = smov 17   ;;  %s863_s25 = smov 16   ;;  %v434_v55 = vperm.slane %v998_v24, 4  ;;  %vm408_vm7 = vcmp.lt.s32.totalorder %v994_v22, 15  ;;  %v411_v2 = vperm.slane %v996_v23, 2 }
  0x1c   : > { %328 = vst [vmem:[#allocation1] ss:$2 sm:$0xff] %v323_v1  ;;  %vm419_vm8 = vcmp.lt.s32.totalorder %v994_v22, 1  ;;  %vm386_vm9 = vcmp.lt.s32.totalorder %v994_v22, 17  ;;  %v389_v20 = vperm.slane %v996_v23, 0  ;;  %vm397_vm10 = vcmp.lt.s32.totalorder %v994_v22, 16 }
  0x1d   : > { %v470_v22 = vld [vmem:[%s1075_s3] sm:$0xf]  ;;  %vm487_vm11 = vcmask 588800   ;;  %vm535_vm12 = vcmask 64512  }
  0x23   : > { %v329_v3 = vld.sshfl [vmem:[#allocation1] sm:$0xff pattern:$0x75316420]  ;;  %v330_v4 = vld.sshfl [vmem:[#allocation1 + $0x8] sm:$0xff pattern:$0x75316420] }
  0x24   : > { %v333_v5 = vpack.c.bf16 %v329_v3, %v329_v3  ;;  %v334_v6 = vpack.c.bf16 %v330_v4, %v330_v4  ;;  %571 = vst [vmem:[#allocation1] ss:$2 sm:$0xff] %v323_v1  ;;  %v412_v3 = vperm.slane %v998_v24, 2  ;;  %v422_v4 = vperm.slane %v996_v23, 3 }
  0x26   : > { %v347_v7 = vsel %vm345_vm0, %v333_v5, 0  ;;  %v350_v8 = vsel %vm345_vm0, %v334_v6, 0  ;;  %v423_v5 = vperm.slane %v998_v24, 3 }
  0x27   : > { %359 = vmatpush.bf16.msra.mxu0 %v347_v7  ;;  %372 = vmatpush.bf16.msra.mxu1 %v350_v8 }
  0x2a   : > { %683 = vmatmul.msk.bf16.vlgmr.msra.gmra.mxu0 %vm341_vm1, %v326_v9  ;;  %684 = vmatmul.msk.bf16.vlgmr.msra.gmra.mxu1 %vm341_vm1, %v326_v9 }
  0x89   : > { %v339_v10 = vpop.permute.xlu0 %338 }
  0xa7   : > { %v361_v11 = vpop.f32.mrf.mxu0  ;;  %v374_v12 = vpop.f32.mrf.mxu1 }
  0xa8   : > { %v362_v13 = vadd.f32 %v361_v11, %v339_v10  ;;  %v375_v14 = vadd.f32 %v374_v12, %v339_v10 }
  0xaa   : > { %v971_v15 = vmax.f32 %v362_v13, 0.0  ;;  %v973_v16 = vmax.f32 %v375_v14, 0.0 }
  0xac   : > { %439 = vrot.lane.b32.xlu2 %v973_v16, %s856_s18  ;;  %461 = vrot.lane.b32.xlu1 %v973_v16, %s857_s19 }
  0xad   : > { %459 = vrot.lane.b32.xlu0 %v971_v15, %s857_s19 }
  0xaf   : > { %v363_v17 = vpop.f32.mrf.mxu0  ;;  %v376_v18 = vpop.f32.mrf.mxu1 }
  0xb4   : > { %448 = vrot.lane.b32.xlu2 %v971_v15, %s858_s20  ;;  %437 = vrot.lane.b32.xlu1 %v971_v15, %s856_s18 }
  0xb5   : > { %450 = vrot.lane.b32.xlu0 %v973_v16, %s858_s20 }
  0xbc   : > { %428 = vrot.lane.b32.xlu2 %v973_v16, %s859_s21  ;;  %426 = vrot.lane.b32.xlu1 %v971_v15, %s859_s21  ;;  %s312_s21 = sand.u32 1, %s844_s28  }
  0xbd   : > { %404 = vrot.lane.b32.xlu0 %v971_v15, %s860_s22 }
  0xc4   : > { %415 = vrot.lane.b32.xlu2 %v971_v15, %s861_s23  ;;  %406 = vrot.lane.b32.xlu1 %v973_v16, %s860_s22  ;;  %s680_s22 = sshll.u32 %s312_s21, 3 }
  0xc5   : > { %417 = vrot.lane.b32.xlu0 %v973_v16, %s861_s23  ;;  %s694_s23 = sshll.u32 %s930_s9, 3  ;;  %s314_s10 = scalar_lea.vmem [#allocation5], %s680_s22 }
  0xc6   : > { %s598_s26 = scalar_lea.hbm %s1080_s8, %s694_s23  ;;  %s600_s12 = sshll.u32 %s314_s10, 4  ;;  %s601_s12 = int_to_ptr.vmem [resolvable:$true] %s600_s12 }
  0xc7   : > { %s602_s13 = sshll.u32 %s598_s26, 4  ;;  %s587_s9 = scalar_lea.sflag [#allocation4], %s312_s21  ;;  %s603_s13 = int_to_ptr.hbm [resolvable:$true] %s602_s13 }
  0xc8   : > { %s800_s17 = sshra.s32 %s603_s13, 4  ;;  %s806_s22 = scalar_lea.hbm %s1080_s8, 16  ;;  %s801_s17 = int_to_ptr.hbm [resolvable:$true] %s800_s17 }
  0xc9   : > { %s802_s18 = scalar_lea.hbm %s801_s17, 8  ;;  %p807_p3 = scmp.lt.s32.totalorder %s801_s17, %s1080_s8 }
  0xca   : > { %p803_p0 = scmp.ne.s32.totalorder %s801_s17, %s802_s18  ;;  %p808_p4 = scmp.lt.s32.totalorder %s806_s22, %s802_s18 }
  0xcc   : > { %382 = vrot.lane.b32.xlu2 %v973_v16, %s862_s24  ;;  %380 = vrot.lane.b32.xlu1 %v971_v15, %s862_s24  ;;  %p804_p1 = pnand %p803_p0, %p947_p5  ;;  %p809_p7 = por %p808_p4, %p807_p3 }
  0xcd   : > { %393 = vrot.lane.b32.xlu0 %v971_v15, %s863_s25 }
  0xce   : > { %p805_p2 = pneg %p804_p1 }
  0xd0   : > { %p810_p8 = pnand %p809_p7, %p805_p2 }
  0xd4   : > { %395 = vrot.lane.b32.xlu1 %v973_v16, %s863_s25  ;;  %484 = vperm.xlu2 %755, %v481_v61  }
  0xd5   : > { %532 = vperm.xlu0 %754, %v529_v19  }
 0x106   : > { %v440_v21 = vpop.permute.xlu2 %439 }
 0x10e   : > { %v449_v33 = vpop.permute.xlu2 %448 }
 0x116   : > { %v429_v56 = vpop.permute.xlu2 %428 }
 0x11e   : > { %v462_v27 = vpop.permute.xlu1 %461  ;;  %v416_v7 = vpop.permute.xlu2 %415 }
 0x11f   : > { %v460_v28 = vpop.permute.xlu0 %459 }
 0x120   : > { %v464_v29 = vsel %vm463_vm2, %v460_v28, %v462_v27  ;;  %v465_v30 = vsel %vm463_vm2, %v462_v27, %v460_v28  ;;  %v401_v27 = vperm.slane %v998_v24, 1 }
 0x121   : > { %v468_v31 = vmul.f32 %v466_v25, %v464_v29  ;;  %v469_v32 = vmul.f32 %v467_v26, %v465_v30  ;;  %v390_v25 = vperm.slane %v998_v24, 0  ;;  %v400_v26 = vperm.slane %v996_v23, 1 }
 0x123   : > { %v479_v34 = vpack.c.bf16 %v468_v31, %v468_v31  ;;  %v480_v35 = vpack.c.bf16 %v469_v32, %v469_v32 }
 0x125   : > { %v493_v38 = vsel %vm491_vm3, %v479_v34, 0  ;;  %v496_v39 = vsel %vm491_vm3, %v480_v35, 0 }
 0x126   : > { %501 = vmatpush.bf16.msra.mxu2 %v493_v38  ;;  %514 = vmatpush.bf16.msra.mxu3 %v496_v39  ;;  %v438_v42 = vpop.permute.xlu1 %437 }
 0x127   : > { %v442_v43 = vsel %vm441_vm4, %v438_v42, %v440_v21  ;;  %v443_v44 = vsel %vm441_vm4, %v440_v21, %v438_v42  ;;  %v451_v45 = vpop.permute.xlu0 %450  ;;  %v383_v21 = vpop.permute.xlu2 %382 }
 0x128   : > { %v446_v46 = vmul.f32 %v444_v36, %v442_v43  ;;  %v447_v47 = vmul.f32 %v445_v37, %v443_v44  ;;  %v453_v48 = vsel %vm452_vm5, %v449_v33, %v451_v45  ;;  %v454_v49 = vsel %vm452_vm5, %v451_v45, %v449_v33 }
 0x129   : > { %v457_v50 = vmul.f32 %v455_v40, %v453_v48  ;;  %v458_v51 = vmul.f32 %v456_v41, %v454_v49 }
 0x12b   : > { %v477_v52 = vpack.c.bf16 %v457_v50, %v446_v46  ;;  %v478_v53 = vpack.c.bf16 %v458_v51, %v447_v47  ;;  %v526_v51 = vld [vmem:[%s1076_s4] sm:$0x3] }
 0x12d   : > { %502 = vmatpush.bf16.msra.mxu2 %v477_v52  ;;  %515 = vmatpush.bf16.msra.mxu3 %v478_v53 }
 0x12e   : > { %v427_v57 = vpop.permute.xlu1 %426 }
 0x12f   : > { %v431_v58 = vsel %vm430_vm6, %v427_v57, %v429_v56  ;;  %v432_v59 = vsel %vm430_vm6, %v429_v56, %v427_v57  ;;  %v405_v60 = vpop.permute.xlu0 %404  ;;  %v485_v23 = vpop.permute.xlu2 %484  ;;  %v573_v56 = vld.sshfl [vmem:[#allocation1 + $0x8] sm:$0xff pattern:$0x75316420] }
 0x130   : > { %v435_v62 = vmul.f32 %v433_v54, %v431_v58  ;;  %v436_v63 = vmul.f32 %v434_v55, %v432_v59  ;;  %v572_v54 = vld.sshfl [vmem:[#allocation1] sm:$0xff pattern:$0x75316420] }
 0x132   : > { %v475_v0 = vpack.c.bf16 %v435_v62, %v971_v15  ;;  %v476_v1 = vpack.c.bf16 %v436_v63, %v973_v16 }
 0x134   : > { %503 = vmatpush.bf16.msra.mxu2 %v475_v0  ;;  %516 = vmatpush.bf16.msra.mxu3 %v476_v1 }
 0x136   : > { %v407_v6 = vpop.permute.xlu1 %406 }
 0x137   : > { %v409_v8 = vsel %vm408_vm7, %v405_v60, %v407_v6  ;;  %v410_v9 = vsel %vm408_vm7, %v407_v6, %v405_v60  ;;  %v418_v10 = vpop.permute.xlu0 %417 }
 0x138   : > { %v413_v11 = vmul.f32 %v411_v2, %v410_v9  ;;  %v414_v12 = vmul.f32 %v412_v3, %v409_v8  ;;  %v420_v13 = vsel %vm419_vm8, %v416_v7, %v418_v10  ;;  %v421_v14 = vsel %vm419_vm8, %v418_v10, %v416_v7 }
 0x139   : > { %v424_v15 = vmul.f32 %v422_v4, %v421_v14  ;;  %v425_v16 = vmul.f32 %v423_v5, %v420_v13 }
 0x13b   : > { %v473_v17 = vpack.c.bf16 %v424_v15, %v413_v11  ;;  %v474_v18 = vpack.c.bf16 %v425_v16, %v414_v12 }
 0x13d   : > { %504 = vmatpush.bf16.msra.mxu2 %v473_v17  ;;  %517 = vmatpush.bf16.msra.mxu3 %v474_v18 }
 0x13e   : > { %v381_v19 = vpop.permute.xlu1 %380 }
 0x13f   : > { %v387_v28 = vsel %vm386_vm9, %v381_v19, %v383_v21  ;;  %v388_v29 = vsel %vm386_vm9, %v383_v21, %v381_v19  ;;  %v394_v30 = vpop.permute.xlu0 %393 }
 0x140   : > { %v391_v34 = vmul.f32 %v389_v20, %v388_v29  ;;  %v392_v35 = vmul.f32 %v390_v25, %v387_v28 }
 0x146   : > { %v396_v31 = vpop.permute.xlu1 %395 }
 0x147   : > { %v398_v32 = vsel %vm397_vm10, %v394_v30, %v396_v31  ;;  %v399_v33 = vsel %vm397_vm10, %v396_v31, %v394_v30  ;;  %v533_v52 = vpop.permute.xlu0 %532 }
 0x148   : > { %v402_v36 = vmul.f32 %v400_v26, %v399_v33  ;;  %v403_v37 = vmul.f32 %v401_v27, %v398_v32 }
 0x14a   : > { %v471_v38 = vpack.c.bf16 %v402_v36, %v391_v34  ;;  %v472_v39 = vpack.c.bf16 %v403_v37, %v392_v35 }
 0x14c   : > { %505 = vmatpush.bf16.msra.mxu2 %v471_v38  ;;  %518 = vmatpush.bf16.msra.mxu3 %v472_v39 }
 0x14f   : > { %685 = vmatmul.msk.bf16.vlgmr.msra.gmra.mxu2 %vm487_vm11, %v470_v22  ;;  %686 = vmatmul.msk.bf16.vlgmr.msra.gmra.mxu3 %vm487_vm11, %v470_v22 }
 0x1d2   : > { %v507_v24 = vpop.f32.mrf.mxu2  ;;  %v520_v40 = vpop.f32.mrf.mxu3 }
 0x1d3   : > { %v508_v41 = vadd.f32 %v507_v24, %v485_v23  ;;  %v521_v42 = vadd.f32 %v520_v40, %v485_v23 }
 0x1d5   : > { %v524_v43 = vmax.f32 %v508_v41, 0.0  ;;  %v525_v44 = vmax.f32 %v521_v42, 0.0 }
 0x1d7   : > { %v527_v45 = vpack.c.bf16 %v524_v43, %v524_v43  ;;  %v528_v46 = vpack.c.bf16 %v525_v44, %v525_v44 }
 0x1d9   : > { %v540_v47 = vsel %vm491_vm3, %v527_v45, 0  ;;  %v543_v48 = vsel %vm491_vm3, %v528_v46, 0 }
 0x1da   : > { %v509_v49 = vpop.f32.mrf.mxu2  ;;  %v522_v50 = vpop.f32.mrf.mxu3  ;;  %552 = vmatpush.bf16.msrb.mxu0 %v540_v47  ;;  %565 = vmatpush.bf16.msrb.mxu1 %v543_v48 }
 0x1dd   : > { %687 = vmatmul.msk.bf16.vlgmr.msrb.gmra.mxu0 %vm535_vm12, %v526_v51  ;;  %688 = vmatmul.msk.bf16.vlgmr.msrb.gmra.mxu1 %vm535_vm12, %v526_v51 }
 0x25a   : > { %v554_v53 = vpop.f32.mrf.mxu0  ;;  %v567_v55 = vpop.f32.mrf.mxu1 }
 0x25b   : > { %v555_v57 = vadd.f32 %v554_v53, %v533_v52  ;;  %v568_v58 = vadd.f32 %v567_v55, %v533_v52 }
 0x25d   : > { %v576_v59 = vadd.f32 %v572_v54, %v555_v57  ;;  %v577_v60 = vadd.f32 %v573_v56, %v568_v58 }
 0x25f   : > { %v579_v61 = vmax.f32 %v577_v60, 0.0  ;;  %v578_v62 = vmax.f32 %v576_v59, 0.0 }
 0x261   : > { %v582_v63 = vrot.slane %v579_v61, 4 }
 0x262   : > { %v569_v0 = vpop.f32.mrf.mxu1  ;;  %v556_v1 = vpop.f32.mrf.mxu0 }
 0x263   : > { %v583_v2 = vsel %vm491_vm3, %v578_v62, %v582_v63 }
 0x264   : > { %585 = vst [vmem:[%s314_s10] sm:$0xff] %v583_v2 }
 0x265   : > { %813 = shalt.err (!%p810_p8)
}
 0x266   : > { %699 = dma.vmem_to_hbm [thread:$0]  (%p947_p5), %s601_s12, 128, %s603_s13, %s587_s9  }
 0x267 PF: > { %p711_p9 = scmp.ge.s32.totalorder %s852_s30, 2  ;;  %s614_s21 = sand.u32 1, %s840_s27  }
 0x268   : > { %s615_s25 = scalar_lea.sflag [#allocation4], %s614_s21 }
 0x269   : > { %p706_p10 = pnand %p711_p9, %p951_p6 }
 0x26b   : > { %p707_p11 = pneg %p706_p10 }
 0x26d   : > { %835 = dma.done.wait (%p707_p11), %s615_s25, 128  }
 0x26e   : > { %837 = vsyncadd (%p707_p11), %s615_s25, 4294967168  ;;  %p19_p12 = scmp.ge.s32.totalorder %s934_s11, 4   ;;  %s1083_s27 = smov %s844_s28 }
 0x26f   : > { %s1084_s28 = smov %s848_s29  ;;  %s1085_s29 = smov %s945_s14 }
 0x270   : > { %s1086_s30 = smov %s934_s11  ;;  %21 = sbr.rel (!%p19_p12) target bundleno = 4 (0x4), region = 92 }
 0x275   :  { %621 = vsyncpa [#allocation3], 1 }
 0x276   :  { %623 = vsyncpa [#allocation3 + $0x1], 1 }
 0x277   :  { %624 = vsyncpa [#allocation4], 1 }
 0x278   :  { %626 = vsyncpa [#allocation4 + $0x1], 1 }

</bundles_post_ra>
